<compile_context>
chip_gen: v5e
topology: v5e:2x2
jax: 0.10.0
libtpu: 0.0.40
codegen_flags: <defaults>
</compile_context>

<pallas_src>
import math

import jax
import jax.numpy as jnp
from jax.experimental import pallas as pl
from jax.experimental.pallas import tpu as pltpu


def _round_up(n, m):
    return ((n + m - 1) // m) * m


def _quality_regression_kernel(x_ref, w1_ref, b1_ref, w2_ref, b2_ref, yt_ref):
    # x_ref:  [TB, C]  native-layout input tile (batch on sublanes)
    # w1_ref: [H, C]   first Linear weight (PyTorch layout), VMEM-resident
    # b1_ref: [H, 1]   first Linear bias as a column (broadcasts over lanes)
    # w2_ref: [H, 1]   second Linear weight as a column
    # b2_ref: [1, 1]   second Linear bias, SMEM scalar
    # yt_ref: [1, TB]  lane-dense output tile (batch on lanes)
    h = jax.lax.dot_general(
        w1_ref[...], x_ref[...],
        dimension_numbers=(((1,), (1,)), ((), ())),
        preferred_element_type=jnp.float32)              # [H, TB]  MXU, N = TB
    h = jnp.maximum(h + b1_ref[...], 0.0)                # bias + ReLU (VPU, f32)
    # Second Linear has out_features == 1: broadcast-multiply + sublane reduce
    # (VPU/XLU) instead of wasting an MXU pass with N = 1.
    y = jnp.sum(h * w2_ref[...], axis=0, keepdims=True)  # [1, TB]
    y = y + b2_ref[0, 0]                                 # scalar bias from SMEM
    yt_ref[...] = y.astype(yt_ref.dtype)


def quality_regression(x, w1, b1, w2, b2, *, block_b=None):
    """Forward pass of QualityRegression.

    x:  [B, C] float32
    w1: [H, C], b1: [H]     (H = C // 2; PyTorch nn.Linear layout)
    w2: [1, H], b2: [1]
    returns: [B, 1]
    """
    B, C = x.shape
    H, C_w = w1.shape
    assert C_w == C and w2.shape == (1, H) and b1.shape == (H,) and b2.shape == (1,)

    b1c = b1.reshape(H, 1).astype(jnp.float32)
    w2c = w2.reshape(H, 1).astype(jnp.float32)
    b2s = b2.reshape(1, 1).astype(jnp.float32)

    # Batch tile size: target ~1 MiB per streamed f32 input tile (review: 64 KiB
    # steps leave most of the HBM roofline on the table), 128-aligned, but
    # clamped so the grid has >= 2 steps whenever B > 128 (v7x: 2 TCs split the
    # "parallel" axis).  Small B gets a single full block (block == full array
    # dims, so the (8,128) rule does not apply).
    if block_b is None:
        block_b = max(128, _round_up((1 << 20) // (4 * C), 128))
    if B <= 128:
        tb = B
    else:
        tb = min(block_b, _round_up(pl.cdiv(B, 2), 128))

    grid = (pl.cdiv(B, tb),)
    # NOTE: no jnp.pad — the ragged last block relies on Pallas partial-edge
    # blocks: garbage input rows only affect their own (OOB, dropped) output
    # columns because every column is computed independently.

    yt = pl.pallas_call(
        _quality_regression_kernel,
        out_shape=jax.ShapeDtypeStruct((1, B), x.dtype),
        grid=grid,
        in_specs=[
            pl.BlockSpec((tb, C), lambda i: (i, 0)),              # streamed input
            pl.BlockSpec((H, C), lambda i: (0, 0)),               # resident weights
            pl.BlockSpec((H, 1), lambda i: (0, 0)),
            pl.BlockSpec((H, 1), lambda i: (0, 0)),
            pl.BlockSpec(memory_space=pltpu.MemorySpace.SMEM),    # scalar b2
        ],
        out_specs=pl.BlockSpec((1, tb), lambda i: (0, i)),
        compiler_params=pltpu.CompilerParams(
            dimension_semantics=("parallel",)),
        cost_estimate=pl.CostEstimate(
            flops=2 * B * C * H + 2 * B * H,
            transcendentals=0,
            bytes_accessed=4 * (B * C + B + H * C + 2 * H + 1)),
    )(x, w1, b1c, w2c, b2s)

    return yt.T                                          # [B, 1] (tiny reshape)


def init_params(key, cma_planes):
    """Deterministic synthetic parameters in PyTorch nn.Linear layout (out, in)."""
    half = cma_planes // 2
    k1, k2, k3, k4 = jax.random.split(key, 4)
    bound1 = 1.0 / math.sqrt(cma_planes)
    bound2 = 1.0 / math.sqrt(half)
    w1 = jax.random.uniform(k1, (half, cma_planes), jnp.float32,
                            minval=-bound1, maxval=bound1)
    b1 = jax.random.uniform(k2, (half,), jnp.float32,
                            minval=-bound1, maxval=bound1)
    w2 = jax.random.uniform(k3, (1, half), jnp.float32,
                            minval=-bound2, maxval=bound2)
    b2 = jax.random.uniform(k4, (1,), jnp.float32,
                            minval=-bound2, maxval=bound2)
    return w1, b1, w2, b2


def _reference(x, w1, b1, w2, b2):
    return jnp.maximum(x @ w1.T + b1, 0.0) @ w2.T + b2


if __name__ == "__main__":
    # Small shapes consistent with the module: batch=2, cma_planes=32.
    B = 2
    CMA_PLANES = 32

    key = jax.random.PRNGKey(0)
    kx, kp, kx2 = jax.random.split(key, 3)
    x = jax.random.normal(kx, (B, CMA_PLANES), dtype=jnp.float32)
    w1, b1, w2, b2 = init_params(kp, CMA_PLANES)

    fwd = jax.jit(quality_regression)

    # Small single-block path.
    out = jax.block_until_ready(fwd(x, w1, b1, w2, b2))
    ref = _reference(x, w1, b1, w2, b2)
    assert out.shape == (B, 1)
    assert jnp.allclose(out, ref, atol=1e-5, rtol=1e-5)

    # Larger tiled path (exercises multi-step grid + ragged edge block without
    # any host-side padding), still cheap.
    B_big = 1300
    x_big = jax.random.normal(kx2, (B_big, CMA_PLANES), dtype=jnp.float32)
    out_big = jax.block_until_ready(fwd(x_big, w1, b1, w2, b2))
    ref_big = _reference(x_big, w1, b1, w2, b2)
    assert out_big.shape == (B_big, 1)
    assert jnp.allclose(out_big, ref_big, atol=1e-4, rtol=1e-4)

    print("KERNEL_OK")
</pallas_src>

<mosaic_0001>
module attributes {stable_mosaic.version = 11 : i64} {
  func.func @_quality_regression_kernel(%arg0: i32, %arg1: memref<2x32xf32, #tpu.memory_space<vmem>>, %arg2: memref<16x32xf32, #tpu.memory_space<vmem>>, %arg3: memref<16x1xf32, #tpu.memory_space<vmem>>, %arg4: memref<16x1xf32, #tpu.memory_space<vmem>>, %arg5: memref<1x1xf32, #tpu.memory_space<smem>>, %arg6: memref<1x2xf32, #tpu.memory_space<vmem>>) attributes {dimension_semantics = [#tpu.dimension_semantics<parallel>], iteration_bounds = array<i64: 1>, scalar_prefetch = 0 : i64, scratch_operands = 0 : i64, tpu.core_type = #tpu.core_type<tc>, window_params = [{transform_indices = @transform_0, window_bounds = array<i64: 2, 32>}, {pipeline_mode = #tpu.pipeline_mode<synchronous>, transform_indices = @transform_1, window_bounds = array<i64: 16, 32>}, {pipeline_mode = #tpu.pipeline_mode<synchronous>, transform_indices = @transform_2, window_bounds = array<i64: 16, 1>}, {pipeline_mode = #tpu.pipeline_mode<synchronous>, transform_indices = @transform_3, window_bounds = array<i64: 16, 1>}, {transform_indices = @transform_4, window_bounds = array<i64: 1, 1>}, {transform_indices = @transform_5, window_bounds = array<i64: 1, 2>}]} {
    %c0 = arith.constant 0 : index
    %c0_0 = arith.constant 0 : index
    %0 = vector.load %arg2[%c0, %c0_0] : memref<16x32xf32, #tpu.memory_space<vmem>>, vector<16x32xf32>
    %c0_1 = arith.constant 0 : index
    %c0_2 = arith.constant 0 : index
    %1 = vector.load %arg1[%c0_1, %c0_2] : memref<2x32xf32, #tpu.memory_space<vmem>>, vector<2x32xf32>
    %cst = arith.constant dense<0.000000e+00> : vector<16x2xf32>
    %2 = tpu.matmul %0, %1, %cst {dimension_numbers = #tpu.dot_dimension_numbers<[1], [1], [0], [0], [0, 0, 1, 0], [], []>} : vector<16x32xf32>, vector<2x32xf32>, vector<16x2xf32> -> vector<16x2xf32>
    %c0_3 = arith.constant 0 : index
    %c0_4 = arith.constant 0 : index
    %3 = vector.load %arg3[%c0_3, %c0_4] : memref<16x1xf32, #tpu.memory_space<vmem>>, vector<16x1xf32>
    %4 = vector.broadcast %3 : vector<16x1xf32> to vector<16x2xf32>
    %5 = arith.addf %2, %4 : vector<16x2xf32>
    %cst_5 = arith.constant 0.000000e+00 : f32
    %6 = vector.broadcast %cst_5 : f32 to vector<16x2xf32>
    %7 = arith.maximumf %5, %6 : vector<16x2xf32>
    %c0_6 = arith.constant 0 : index
    %c0_7 = arith.constant 0 : index
    %8 = vector.load %arg4[%c0_6, %c0_7] : memref<16x1xf32, #tpu.memory_space<vmem>>, vector<16x1xf32>
    %9 = vector.broadcast %8 : vector<16x1xf32> to vector<16x2xf32>
    %10 = arith.mulf %7, %9 : vector<16x2xf32>
    %cst_8 = arith.constant dense<0.000000e+00> : vector<2xf32>
    %11 = vector.multi_reduction <add>, %10, %cst_8 [0] : vector<16x2xf32> to vector<2xf32>
    %12 = vector.shape_cast %11 : vector<2xf32> to vector<1x2xf32>
    %c0_9 = arith.constant 0 : index
    %c0_10 = arith.constant 0 : index
    %13 = memref.load %arg5[%c0_9, %c0_10] : memref<1x1xf32, #tpu.memory_space<smem>>
    %14 = vector.broadcast %13 : f32 to vector<1x2xf32>
    %15 = arith.addf %12, %14 : vector<1x2xf32>
    %c0_11 = arith.constant 0 : index
    %c0_12 = arith.constant 0 : index
    %16 = vector.load %arg6[%c0_11, %c0_12] : memref<1x2xf32, #tpu.memory_space<vmem>>, vector<1x2xf32>
    tpu.vector_store %arg6[%c0_11, %c0_12], %15 {strides = array<i32>} : memref<1x2xf32, #tpu.memory_space<vmem>>, vector<1x2xf32>,
    return
  }
  func.func @transform_0(%arg0: i32) -> (i32, i32) {
    %c0_i32 = arith.constant 0 : i32
    %c0_i32_0 = arith.constant 0 : i32
    return %arg0, %c0_i32 : i32, i32
  }
  func.func @transform_1(%arg0: i32) -> (i32, i32) {
    %c0_i32 = arith.constant 0 : i32
    %c0_i32_0 = arith.constant 0 : i32
    %c0_i32_1 = arith.constant 0 : i32
    return %c0_i32, %c0_i32_0 : i32, i32
  }
  func.func @transform_2(%arg0: i32) -> (i32, i32) {
    %c0_i32 = arith.constant 0 : i32
    %c0_i32_0 = arith.constant 0 : i32
    %c0_i32_1 = arith.constant 0 : i32
    return %c0_i32, %c0_i32_0 : i32, i32
  }
  func.func @transform_3(%arg0: i32) -> (i32, i32) {
    %c0_i32 = arith.constant 0 : i32
    %c0_i32_0 = arith.constant 0 : i32
    %c0_i32_1 = arith.constant 0 : i32
    return %c0_i32, %c0_i32_0 : i32, i32
  }
  func.func @transform_4(%arg0: i32) -> (i32, i32) {
    %c0_i32 = arith.constant 0 : i32
    %c0_i32_0 = arith.constant 0 : i32
    %c0_i32_1 = arith.constant 0 : i32
    return %c0_i32, %c0_i32_0 : i32, i32
  }
  func.func @transform_5(%arg0: i32) -> (i32, i32) {
    %c0_i32 = arith.constant 0 : i32
    %c0_i32_0 = arith.constant 0 : i32
    return %c0_i32, %arg0 : i32, i32
  }
}

</mosaic_0001>

<bundles_post_ra>
// kernel: quality_regression.1
= control target key start
LH: loop header
LB: loop body
LE: loop exit
PB: predicated region body
PF: predicated region fallthrough
CT: control target
= control target key end

     0   :  { %vm37_vm0 = vcmask 261120   ;;  %v151_v3 = vmov 0   ;;  %s210_s0 = inlined_call_operand.vmem [shape: f32[2,32], index: 0, kind: input, shape index: {}]   ;;  %s211_s1 = inlined_call_operand.vmem [shape: f32[16,32], index: 1, kind: input, shape index: {}]   ;;  %s212_s2 = inlined_call_operand.vmem [shape: f32[16,1], index: 2, kind: input, shape index: {}]   ;;  %s213_s3 = inlined_call_operand.vmem [shape: f32[16,1], index: 3, kind: input, shape index: {}]   ;;  %s214_s4 = inlined_call_operand.<no memory space> [shape: f32[1,1], index: 4, kind: input, shape index: {}]   ;;  %s215_s5 = inlined_call_operand.hbm [shape: f32[1,2], index: 5, kind: output, shape index: {}]  }
   0x1   :  { %v24_v0 = vld [vmem:[%s210_s0] sm:$0x3]  ;;  %123 = vset.pattern.permute.xlu0 %v151_v3  ;;  %124 = vset.pattern.permute.xlu1 %v151_v3  ;;  %v23_v5 = vld [vmem:[%s211_s1 + $0x8] sm:$0xff] }
   0x2   :  { %v25_v1 = vld [vmem:[%s212_s2] sm:$0xff]  ;;  %117 = vmatpush.xpose.msk.msra.mxu0 %vm37_vm0, %v24_v0  ;;  %120 = vmatpush.xpose.msk.msra.mxu1 %vm37_vm0, %v24_v0 }
   0x3   :  { %v72_v2 = vld [vmem:[%s213_s3] sm:$0xff] }
   0x4   :  { %v22_v4 = vld [vmem:[%s211_s1] sm:$0xff] }
   0x5   :  { %11 = vsyncpa [#allocation4], 0  ;;  %29 = vperm.xlu0 %123, %v25_v1   ;;  %76 = vperm.xlu1 %124, %v72_v2   ;;  %v26_v6 = vld [vmem:[%s212_s2 + $0x8] sm:$0xff]  ;;  %vm86_vm1 = vcmask 15360   ;;  %v97_v28 = vstv %s214_s4  ;;  %s108_s9 = sshll.u32 %s215_s5, 4  ;;  %vm99_vm2 = vcmask 8192   ;;  %s109_s9 = int_to_ptr.hbm [resolvable:$true] %s108_s9 }
   0x6   :  { %118 = vmatmul.msk.f32.vlgmr.msra.gmra.mxu0 %vm37_vm0, %v22_v4  ;;  %119 = vmatmul.msk.f32.vlgmr.msra.gmra.mxu1 %vm37_vm0, %v23_v5  ;;  %v73_v7 = vld [vmem:[%s213_s3 + $0x8] sm:$0xff]  ;;  %s152_s3 = smov [#allocation3]  }
   0x7   :  { %s106_s6 = sshll.u32 %s152_s3, 4  ;;  %s107_s6 = int_to_ptr.vmem [resolvable:$true] %s106_s6 }
   0xd   :  { %34 = vperm.xlu0 %123, %v26_v6   ;;  %81 = vperm.xlu1 %124, %v73_v7  }
  0x77   :  { %v30_v8 = vpop.permute.xlu0 %29  ;;  %v77_v9 = vpop.permute.xlu1 %76 }
  0x7f   :  { %v35_v11 = vpop.permute.xlu0 %34  ;;  %v82_v17 = vpop.permute.xlu1 %81 }
  0x83   :  { %v64_v10 = vpop.f32.mrf.mxu0  ;;  %v67_v13 = vpop.f32.mrf.mxu1 }
  0x84   :  { %v65_v12 = vadd.f32 %v64_v10, %v30_v8  ;;  %v68_v14 = vadd.f32 %v67_v13, %v35_v11 }
  0x86   :  { %v70_v15 = vmax.f32 %v65_v12, 0.0  ;;  %v71_v16 = vmax.f32 %v68_v14, 0.0 }
  0x88   :  { %v84_v18 = vmul.f32 %v77_v9, %v70_v15  ;;  %v85_v19 = vmul.f32 %v82_v17, %v71_v16 }
  0x8a   :  { %v87_v20 = vsel %vm86_vm1, %v84_v18, 0.0  ;;  %v88_v21 = vsel %vm86_vm1, %v85_v19, 0.0 }
  0x8b   :  { %v89_v22 = vadd.f32 %v88_v21, %v87_v20 }
  0x8d   :  { %v90_v23 = vrot.slane %v89_v22, 4 }
  0x8f   :  { %v91_v24 = vadd.f32 %v90_v23, %v89_v22 }
  0x91   :  { %v92_v25 = vrot.slane %v91_v24, 2 }
  0x93   :  { %v93_v26 = vadd.f32 %v92_v25, %v91_v24 }
  0x95   :  { %v94_v27 = vrot.slane %v93_v26, 1 }
  0x97   :  { %v95_v29 = vadd.f32 %v94_v27, %v93_v26 }
  0x99   :  { %v98_v30 = vadd.f32 %v97_v28, %v95_v29 }
  0x9b   :  { %100 = vst.msk [vmem:[#allocation3] sm:$0x1] %vm99_vm2, %v98_v30 }
  0x9c   :  { %111 = dma.vmem_to_hbm [thread:$0]  %s107_s6, 16, %s109_s9, [#allocation4]  }
  0x9d   :  { %149 = dma.done.wait [#allocation4], 16  }
  0x9e   :  { %150 = vsyncadd [#allocation4], 4294967280 }
  0x9f   :  { %116 = vsyncpa [#allocation4], 1 }

</bundles_post_ra>
